<compile_context>
chip_gen: v7x
topology: tpu7x:2x2x1
jax: 0.10.0
libtpu: 0.0.40
codegen_flags: <defaults>
</compile_context>

<pallas_src>
import jax
import jax.numpy as jnp
from jax.experimental import pallas as pl
from jax.experimental.pallas import tpu as pltpu

LANES = 128  # vreg lane width


def _round_up(v, m):
    return ((v + m - 1) // m) * m


def mlp_kernel(x_ref, w1_ref, b1_ref, w2_ref, b2_ref, o_ref):
    # x arrives as f32; cast to bf16 on the VPU (hidden under the input DMA)
    # instead of paying a separate wrapper-side cast pass over HBM.
    x_bf = x_ref[...].astype(jnp.bfloat16)
    # First (block-diagonal) linear on the MXU: bf16 x bf16 -> f32 accumulate.
    h = jnp.dot(x_bf, w1_ref[...], preferred_element_type=jnp.float32)
    # Bias add (VPU) + tanh (EUP) epilogue in f32 (portable: no bf16 VPU/EUP on v5e).
    h = jnp.tanh(h + b1_ref[...])
    # Second (block-diagonal) linear: explicit bf16 operands, f32 accumulate.
    out = jnp.dot(h.astype(jnp.bfloat16), w2_ref[...],
                  preferred_element_type=jnp.float32) + b2_ref[...]
    # Lane-dense bf16 store: unmasked vst, half the HBM writeback of f32.
    o_ref[...] = out.astype(o_ref.dtype)


def mlp_forward(x, w1, b1, w2, b2, *, block_rows=2048, min_grid=2):
    """Forward pass of MLP: Linear(D,D) -> Tanh -> Linear(D,2).

    x : (B, ...)  -- flattened to (B, D) like x.view(x.size(0), -1)
    w1: (D, D)    -- PyTorch Linear layout (out, in)
    b1: (D,)
    w2: (2, D)    -- PyTorch Linear layout (out, in)
    b2: (2,)
    Returns (B, 2) float32.
    """
    B = x.shape[0]
    x2d = x.reshape(B, -1).astype(jnp.float32)   # no-op cast if already f32
    D = x2d.shape[1]
    out_dim = w2.shape[0]

    # Lane-packing factor: pack `pack` logical rows into one 128-lane row when the
    # feature dim is small (D divides 128). D=32 -> pack=4 -> full MXU feed.
    pack = LANES // D if (D <= 64 and LANES % D == 0) else 1
    d_in = D * pack
    d_out = out_dim * pack
    out_pad = _round_up(max(d_out, LANES), LANES)   # lane-dense padded output width

    # --- parameter prep (hoist out of hot loops if called repeatedly) ---
    eye = jnp.eye(pack, dtype=jnp.float32)
    w1_blk = jnp.kron(eye, w1.T.astype(jnp.float32)).astype(jnp.bfloat16)   # (d_in, d_in)
    b1_blk = jnp.tile(b1.astype(jnp.float32), pack).reshape(1, d_in)        # (1, d_in)
    w2_blk = jnp.kron(eye, w2.T.astype(jnp.float32))                        # (d_in, d_out)
    w2_pad = jnp.zeros((d_in, out_pad), jnp.bfloat16).at[:, :d_out].set(
        w2_blk.astype(jnp.bfloat16))                                        # (d_in, 128)
    b2_pad = jnp.zeros((1, out_pad), jnp.float32).at[:, :d_out].set(
        jnp.tile(b2.astype(jnp.float32), pack))                             # (1, 128)

    # Pack the batch: pad B to a multiple of `pack` (only if needed), then the
    # (B, D) -> (B/pack, pack*D) reshape is a free contiguous relabel.
    rows = -(-B // pack)
    if rows * pack != B:
        x2d = jnp.pad(x2d, ((0, rows * pack - B), (0, 0)))
    x_packed = x2d.reshape(rows, d_in)

    # Packed-row tile: as big as possible (per-grid-step overhead ~0.35us) but keep
    # at least `min_grid` steps when there is enough work so the "parallel" axis
    # can shard across both TensorCores on v7x.  Multiple of 16 keeps bf16-packed
    # sublane layouts clean.  VMEM at 2048 rows is only a few MB double-buffered.
    if rows >= 16 * min_grid:
        tb = min(block_rows, _round_up(-(-rows // min_grid), 16))
    else:
        tb = min(block_rows, _round_up(rows, 16))
    tb = max(16, tb)
    rows_pad = _round_up(rows, tb)
    if rows_pad != rows:
        x_packed = jnp.pad(x_packed, ((0, rows_pad - rows), (0, 0)))
    grid = (rows_pad // tb,)

    cost = pl.CostEstimate(
        flops=2 * rows_pad * d_in * (d_in + out_pad),
        transcendentals=rows_pad * d_in,
        bytes_accessed=(rows_pad * d_in * 4          # f32 packed input
                        + d_in * d_in * 2            # bf16 W1 block
                        + d_in * 4                   # f32 b1
                        + d_in * out_pad * 2         # bf16 W2 block (padded)
                        + out_pad * 4                # f32 b2
                        + rows_pad * out_pad * 2),   # bf16 padded output
    )

    out_packed = pl.pallas_call(
        mlp_kernel,
        out_shape=jax.ShapeDtypeStruct((rows_pad, out_pad), jnp.bfloat16),
        grid_spec=pltpu.PrefetchScalarGridSpec(
            num_scalar_prefetch=0,
            grid=grid,
            in_specs=[
                pl.BlockSpec((tb, d_in), lambda i: (i, 0)),       # packed x: streamed
                pl.BlockSpec((d_in, d_in), lambda i: (0, 0)),     # W1 blk: VMEM-resident
                pl.BlockSpec((1, d_in), lambda i: (0, 0)),        # b1: VMEM-resident
                pl.BlockSpec((d_in, out_pad), lambda i: (0, 0)),  # W2 blk (padded)
                pl.BlockSpec((1, out_pad), lambda i: (0, 0)),     # b2 (padded)
            ],
            out_specs=pl.BlockSpec((tb, out_pad), lambda i: (i, 0)),
        ),
        compiler_params=pltpu.CompilerParams(
            dimension_semantics=("parallel",)),
        cost_estimate=cost,
    )(x_packed, w1_blk, b1_blk, w2_pad, b2_pad)

    # Unpack: packed row r, lane segment [k*out_dim:(k+1)*out_dim] is logical row
    # r*pack + k; slice useful lanes/rows and unfold back to (B, out_dim).
    out = out_packed[:rows, :d_out].reshape(rows * pack, out_dim)[:B]
    return out.astype(jnp.float32)


if __name__ == "__main__":
    key = jax.random.PRNGKey(0)
    B, D = 512, 32  # data_dimensions = 32 (as in the experiment); small batch

    k_x, k_w1, k_b1, k_w2, k_b2 = jax.random.split(key, 5)

    # nn.Linear-style uniform(-1/sqrt(fan_in), 1/sqrt(fan_in)) init.
    bound = 1.0 / jnp.sqrt(D)
    w1_pt = jax.random.uniform(k_w1, (D, D), jnp.float32, -bound, bound)   # (out, in)
    b1 = jax.random.uniform(k_b1, (D,), jnp.float32, -bound, bound)
    w2_pt = jax.random.uniform(k_w2, (2, D), jnp.float32, -bound, bound)   # (out, in)
    b2 = jax.random.uniform(k_b2, (2,), jnp.float32, -bound, bound)

    x = jax.random.normal(k_x, (B, D), jnp.float32)

    out = mlp_forward(x, w1_pt, b1, w2_pt, b2)
    out = jax.block_until_ready(out)

    # Pure-JAX f32 reference (kernel uses bf16 MXU operands and bf16 output ->
    # loose tolerance).
    ref = jnp.tanh(x @ w1_pt.T + b1) @ w2_pt.T + b2
    assert out.shape == (B, 2)
    assert jnp.allclose(out, ref, atol=5e-2, rtol=5e-2), "mismatch vs reference"

    print("KERNEL_OK")
</pallas_src>

<mosaic_0001>
module attributes {stable_mosaic.version = 11 : i64} {
  func.func @mlp_kernel(%arg0: i32, %arg1: memref<64x128xf32, #tpu.memory_space<vmem>>, %arg2: memref<128x128xbf16, #tpu.memory_space<vmem>>, %arg3: memref<1x128xf32, #tpu.memory_space<vmem>>, %arg4: memref<128x128xbf16, #tpu.memory_space<vmem>>, %arg5: memref<1x128xf32, #tpu.memory_space<vmem>>, %arg6: memref<64x128xbf16, #tpu.memory_space<vmem>>) attributes {dimension_semantics = [#tpu.dimension_semantics<parallel>], iteration_bounds = array<i64: 2>, scalar_prefetch = 0 : i64, scratch_operands = 0 : i64, tpu.core_type = #tpu.core_type<tc>, window_params = [{transform_indices = @transform_0, window_bounds = array<i64: 64, 128>}, {pipeline_mode = #tpu.pipeline_mode<synchronous>, transform_indices = @transform_1, window_bounds = array<i64: 128, 128>}, {pipeline_mode = #tpu.pipeline_mode<synchronous>, transform_indices = @transform_2, window_bounds = array<i64: 1, 128>}, {pipeline_mode = #tpu.pipeline_mode<synchronous>, transform_indices = @transform_3, window_bounds = array<i64: 128, 128>}, {pipeline_mode = #tpu.pipeline_mode<synchronous>, transform_indices = @transform_4, window_bounds = array<i64: 1, 128>}, {transform_indices = @transform_5, window_bounds = array<i64: 64, 128>}]} {
    %c0 = arith.constant 0 : index
    %c0_0 = arith.constant 0 : index
    %0 = vector.load %arg1[%c0, %c0_0] : memref<64x128xf32, #tpu.memory_space<vmem>>, vector<64x128xf32>
    %1 = arith.truncf %0 : vector<64x128xf32> to vector<64x128xbf16>
    %c0_1 = arith.constant 0 : index
    %c0_2 = arith.constant 0 : index
    %2 = vector.load %arg2[%c0_1, %c0_2] : memref<128x128xbf16, #tpu.memory_space<vmem>>, vector<128x128xbf16>
    %cst = arith.constant dense<0.000000e+00> : vector<64x128xf32>
    %3 = tpu.matmul %1, %2, %cst {dimension_numbers = #tpu.dot_dimension_numbers<[1], [0], [0], [1], [0, 0, 1, 1], [], []>} : vector<64x128xbf16>, vector<128x128xbf16>, vector<64x128xf32> -> vector<64x128xf32>
    %c0_3 = arith.constant 0 : index
    %c0_4 = arith.constant 0 : index
    %4 = vector.load %arg3[%c0_3, %c0_4] : memref<1x128xf32, #tpu.memory_space<vmem>>, vector<1x128xf32>
    %5 = vector.broadcast %4 : vector<1x128xf32> to vector<64x128xf32>
    %6 = arith.addf %3, %5 : vector<64x128xf32>
    %7 = math.tanh %6 : vector<64x128xf32>
    %8 = arith.truncf %7 : vector<64x128xf32> to vector<64x128xbf16>
    %c0_5 = arith.constant 0 : index
    %c0_6 = arith.constant 0 : index
    %9 = vector.load %arg4[%c0_5, %c0_6] : memref<128x128xbf16, #tpu.memory_space<vmem>>, vector<128x128xbf16>
    %cst_7 = arith.constant dense<0.000000e+00> : vector<64x128xf32>
    %10 = tpu.matmul %8, %9, %cst_7 {dimension_numbers = #tpu.dot_dimension_numbers<[1], [0], [0], [1], [0, 0, 1, 1], [], []>} : vector<64x128xbf16>, vector<128x128xbf16>, vector<64x128xf32> -> vector<64x128xf32>
    %c0_8 = arith.constant 0 : index
    %c0_9 = arith.constant 0 : index
    %11 = vector.load %arg5[%c0_8, %c0_9] : memref<1x128xf32, #tpu.memory_space<vmem>>, vector<1x128xf32>
    %12 = vector.broadcast %11 : vector<1x128xf32> to vector<64x128xf32>
    %13 = arith.addf %10, %12 : vector<64x128xf32>
    %14 = arith.truncf %13 : vector<64x128xf32> to vector<64x128xbf16>
    %c0_10 = arith.constant 0 : index
    %c0_11 = arith.constant 0 : index
    %15 = vector.load %arg6[%c0_10, %c0_11] : memref<64x128xbf16, #tpu.memory_space<vmem>>, vector<64x128xbf16>
    tpu.vector_store %arg6[%c0_10, %c0_11], %14 {strides = array<i32>} : memref<64x128xbf16, #tpu.memory_space<vmem>>, vector<64x128xbf16>,
    return
  }
  func.func @transform_0(%arg0: i32) -> (i32, i32) {
    %c0_i32 = arith.constant 0 : i32
    %c0_i32_0 = arith.constant 0 : i32
    return %arg0, %c0_i32 : i32, i32
  }
  func.func @transform_1(%arg0: i32) -> (i32, i32) {
    %c0_i32 = arith.constant 0 : i32
    %c0_i32_0 = arith.constant 0 : i32
    %c0_i32_1 = arith.constant 0 : i32
    return %c0_i32, %c0_i32_0 : i32, i32
  }
  func.func @transform_2(%arg0: i32) -> (i32, i32) {
    %c0_i32 = arith.constant 0 : i32
    %c0_i32_0 = arith.constant 0 : i32
    %c0_i32_1 = arith.constant 0 : i32
    return %c0_i32, %c0_i32_0 : i32, i32
  }
  func.func @transform_3(%arg0: i32) -> (i32, i32) {
    %c0_i32 = arith.constant 0 : i32
    %c0_i32_0 = arith.constant 0 : i32
    %c0_i32_1 = arith.constant 0 : i32
    return %c0_i32, %c0_i32_0 : i32, i32
  }
  func.func @transform_4(%arg0: i32) -> (i32, i32) {
    %c0_i32 = arith.constant 0 : i32
    %c0_i32_0 = arith.constant 0 : i32
    %c0_i32_1 = arith.constant 0 : i32
    return %c0_i32, %c0_i32_0 : i32, i32
  }
  func.func @transform_5(%arg0: i32) -> (i32, i32) {
    %c0_i32 = arith.constant 0 : i32
    %c0_i32_0 = arith.constant 0 : i32
    return %arg0, %c0_i32 : i32, i32
  }
}

</mosaic_0001>

<bundles_post_ra>
// kernel: tpu_custom_call.1
= control target key start
LH: loop header
LB: loop body
LE: loop exit
PB: predicated region body
PF: predicated region fallthrough
CT: control target
= control target key end

     0   :  { %10 = vsyncpa [#allocation3], 0  ;;  %s1420_s0 = inlined_call_operand.hbm [shape: f32[128,128], index: 0, kind: input, shape index: {}]   ;;  %s1421_s1 = inlined_call_operand.hbm [shape: bf16[128,128], index: 1, kind: input, shape index: {}]   ;;  %s1422_s2 = inlined_call_operand.vmem [shape: f32[1,128], index: 2, kind: input, shape index: {}]   ;;  %s1423_s3 = inlined_call_operand.hbm [shape: bf16[128,128], index: 3, kind: input, shape index: {}]   ;;  %s1424_s4 = inlined_call_operand.vmem [shape: f32[1,128], index: 4, kind: input, shape index: {}]   ;;  %s1425_s5 = inlined_call_operand.hbm [shape: bf16[128,128], index: 5, kind: output, shape index: {}]  }
   0x1   :  { %12 = vsyncpa [#allocation3 + $0x1], 0 }
   0x2   :  { %13 = vsyncpa [#allocation6], 0 }
   0x3   :  { %14 = vsyncpa [#allocation4], 0 }
   0x4   :  { %16 = vsyncpa [#allocation4 + $0x1], 0  ;;  %s1169_s18 = smov 0   ;;  %s1171_s19 = smov 0  }
   0x5   :  { %s1173_s20 = smov 0   ;;  %s1175_s21 = smov 0  }
   0x6 LB: > { %s1190_s22 = sadd.s32 4294967295, %s1127_s21   ;;  %s717_s23 = sadd.s32 4294967294, %s1127_s21   ;;  %s1127_s21 = sphi %s1175_s21, %s1445_s21   ;;  %s1123_s20 = sphi %s1173_s20, %s1444_s20   ;;  %s1119_s19 = sphi %s1171_s19, %s1443_s19   ;;  %s1115_s18 = sphi %s1169_s18, %s1442_s18  }
   0x7   : > { %p42_p0 = scmp.ne.s32.totalorder %s1119_s19, %s1115_s18  ;;  %p1426_p1 = scmp.eq.s32.totalorder %s1190_s22, 0 }
   0x8   : > { %p156_p3 = scmp.eq.s32.totalorder %s717_s23, 1  ;;  %p718_p5 = scmp.ge.s32.totalorder %s1127_s21, 1 }
   0x9   : > { %p1199_p4 = por %p1426_p1, %p42_p0  ;;  %p163_p7 = scmp.lt.s32.totalorder %s1127_s21, 3 }
   0xa   : > { %p1204_p6 = por %p156_p3, %p42_p0  ;;  %s1129_s27 = smov [#allocation5]  }
   0xb   : > { %s1429_s24 = scalar_select %p1199_p4, 1, 0 }
   0xc   : > { %s1430_s25 = scalar_select %p1204_p6, 1, 0 }
   0xd   : > { %p1209_p8 = pnand %p718_p5, %p163_p7  ;;  %s175_s28 = sshll.u32 %s1129_s27, 4  ;;  %s1213_s28 = int_to_ptr.vmem [resolvable:$true] %s175_s28 }
   0xe   : > { %s1130_s30 = smov [#allocation7]   ;;  %s971_s9 = scalar_lea.hbm %s1421_s1, 1024 }
   0xf   : > { %p878_p9 = pneg %p1209_p8  ;;  %s191_s6 = sshll.u32 %s1130_s30, 4  ;;  %s1224_s6 = int_to_ptr.vmem [resolvable:$true] %s191_s6 }
  0x10   : > { %p972_p12 = scmp.ne.s32.totalorder %s1421_s1, %s971_s9  ;;  %p978_p5 = scmp.lt.u32.totalorder %s971_s9, %s1421_s1 }
  0x11   : > { %p1220_p11 = pnand %p878_p9, %p1426_p1 }
  0x13   : > { %p973_p13 = pneg %p1220_p11 }
  0x15   : > { %p974_p0 = pnand %p973_p13, %p972_p12 }
  0x17   : > { %p975_p3 = pneg %p974_p0 }
  0x19   : > { %p980_p7 = pnand %p978_p5, %p975_p3 }
  0x1b   : > { %983 = shalt.err (!%p980_p7)
}
  0x1c   : > { %s984_s14 = scalar_lea.vmem %s1213_s28, 1024  ;;  %p992_p2 = scmp.lt.s32.totalorder %s1213_s28, %s1213_s28 }
  0x1d   : > { %p985_p9 = scmp.ne.s32.totalorder %s1213_s28, %s984_s14  ;;  %p993_p12 = scmp.lt.s32.totalorder %s984_s14, %s984_s14 }
  0x1f   : > { %p987_p10 = pnand %p985_p9, %p973_p13  ;;  %p994_p0 = por %p993_p12, %p992_p2 }
  0x21   : > { %p988_p1 = pneg %p987_p10 }
  0x23   : > { %p995_p6 = pnand %p994_p0, %p988_p1 }
  0x25   : > { %998 = shalt.err (!%p995_p6)
}
  0x26   : > { %s1131_s15 = smov 64   ;;  %s1132_s16 = smov 4  }
  0x27   : > { %881 = dma.hbm_to_vmem [thread:$0]  (!%p1220_p11), %s1421_s1, 1024, %s1213_s28, [#allocation6], %s1131_s15, %s1131_s15, %s1132_s16  }
  0x28   : > { %s999_s7 = scalar_lea.hbm %s1423_s3, 1024 }
  0x29   : > { %p1000_p2 = scmp.ne.s32.totalorder %s1423_s3, %s999_s7  ;;  %p1006_p10 = scmp.lt.u32.totalorder %s999_s7, %s1423_s3 }
  0x2b   : > { %p1002_p1 = pnand %p1000_p2, %p973_p13 }
  0x2d   : > { %p1003_p6 = pneg %p1002_p1 }
  0x2f   : > { %p1008_p3 = pnand %p1006_p10, %p1003_p6 }
  0x31   : > { %1011 = shalt.err (!%p1008_p3)
}
  0x32   : > { %s1012_s28 = scalar_lea.vmem %s1224_s6, 1024  ;;  %p1020_p12 = scmp.lt.s32.totalorder %s1224_s6, %s1224_s6 }
  0x33   : > { %p1013_p5 = scmp.ne.s32.totalorder %s1224_s6, %s1012_s28  ;;  %p1021_p0 = scmp.lt.s32.totalorder %s1012_s28, %s1012_s28 }
  0x35   : > { %p1015_p7 = pnand %p1013_p5, %p973_p13  ;;  %p1022_p2 = por %p1021_p0, %p1020_p12 }
  0x37   : > { %p1016_p9 = pneg %p1015_p7 }
  0x39   : > { %p1023_p1 = pnand %p1022_p2, %p1016_p9 }
  0x3b   : > { %1026 = shalt.err (!%p1023_p1)
}
  0x3c   : > { %884 = dma.hbm_to_vmem [thread:$0]  (!%p1220_p11), %s1423_s3, 1024, %s1224_s6, [#allocation6], %s1131_s15, %s1131_s15, %s1132_s16  }
  0x3d   : > { %s1279_s14 = sadd.s32 1, %s1127_s21   ;;  %s29_s29 = sadd.s32 1, %s1123_s20 }
  0x3e   : > { %s26_s17 = ssub.s32 %s1127_s21, %s1279_s14  ;;  %p36_p13 = scmp.ne.s32.totalorder %s1123_s20, %s1119_s19 }
  0x3f   : > { %p27_p6 = scmp.eq.s32.totalorder %s26_s17, 0  ;;  %p37_p10 = scmp.eq.s32.totalorder %s1127_s21, 0 }
  0x40   : > { %p1433_p3 = scmp.eq.s32.totalorder %s1190_s22, 1  ;;  %p895_p7 = scmp.lt.s32.totalorder %s1127_s21, 2 }
  0x41   : > { %s1295_s27 = scalar_select %p27_p6, %s1123_s20, %s29_s29  }
  0x42   : > { %p1289_p5 = por %p1433_p3, %p36_p13  ;;  %p38_p9 = por %p37_p10, %p36_p13 }
  0x43   : > { %s208_s30 = sand.u32 1, %s1123_s20   ;;  %s761_s6 = sshll.u32 %s1127_s21, 10 }
  0x44   : > { %s1434_s23 = scalar_select %p1289_p5, 1, 0 }
  0x45   : > { %s722_s7 = sshll.u32 %s208_s30, 6  ;;  %s1302_s8 = scalar_lea.hbm %s1420_s0, %s761_s6 }
  0x46   : > { %s212_s9 = scalar_lea.vmem [#allocation2], %s722_s7  ;;  %p1306_p11 = pnand %p895_p7, %p38_p9 }
  0x47   : > { %s219_s10 = sshll.u32 %s212_s9, 4  ;;  %s1310_s28 = scalar_lea.sflag [#allocation3], %s208_s30  ;;  %s1304_s10 = int_to_ptr.vmem [resolvable:$true] %s219_s10 }
  0x48   : > { %s1027_s12 = scalar_lea.hbm %s1302_s8, 1024  ;;  %p1029_p0 = pneg %p1306_p11 }
  0x49   : > { %p1028_p12 = scmp.ne.s32.totalorder %s1302_s8, %s1027_s12  ;;  %s1032_s17 = scalar_lea.hbm %s1420_s0, 2048 }
  0x4a   : > { %p1033_p13 = scmp.lt.u32.totalorder %s1302_s8, %s1420_s0  ;;  %p1034_p6 = scmp.lt.u32.totalorder %s1032_s17, %s1027_s12 }
  0x4b   : > { %p1030_p2 = pnand %p1029_p0, %p1028_p12  ;;  %p1036_p3 = scmp.lt.u32.totalorder %s1027_s12, %s1302_s8 }
  0x4c   : > { %p1035_p10 = por %p1034_p6, %p1033_p13 }
  0x4d   : > { %p1031_p1 = pneg %p1030_p2 }
  0x4e   : > { %p1037_p7 = por %p1036_p3, %p1035_p10 }
  0x50   : > { %p1038_p9 = pnand %p1037_p7, %p1031_p1 }
  0x52   : > { %1041 = shalt.err (!%p1038_p9)
}
  0x53   : > { %s1042_s30 = scalar_lea.vmem %s1304_s10, 1024  ;;  %s1133_s15 = smov [#allocation2]  }
  0x54   : > { %p1043_p12 = scmp.ne.s32.totalorder %s1304_s10, %s1042_s30  ;;  %s1047_s16 = sshll.u32 %s1133_s15, 4  ;;  %s1048_s16 = int_to_ptr.vmem [resolvable:$false] %s1047_s16 }
  0x55   : > { %s1049_s9 = scalar_lea.vmem %s1048_s16, 2048  ;;  %p1050_p4 = scmp.lt.s32.totalorder %s1304_s10, %s1048_s16 }
  0x56   : > { %p1045_p2 = pnand %p1043_p12, %p1029_p0  ;;  %p1051_p13 = scmp.lt.s32.totalorder %s1049_s9, %s1042_s30 }
  0x58   : > { %p1046_p5 = pneg %p1045_p2  ;;  %p1052_p6 = por %p1051_p13, %p1050_p4 }
  0x5a   : > { %p1053_p10 = pnand %p1052_p6, %p1046_p5 }
  0x5c   : > { %1056 = shalt.err (!%p1053_p10)
}
  0x5d   : > { %s1134_s12 = smov 128   ;;  %s1135_s13 = smov 8  }
  0x5e   : > { %888 = dma.hbm_to_vmem [thread:$0]  (!%p1306_p11), %s1302_s8, 1024, %s1304_s10, %s1310_s28, %s1134_s12, %s1134_s12, %s1135_s13  }
  0x5f   : > { %231 = sbr.rel (%p1209_p8) target bundleno = 612 (0x264), region = 40  ;;  %s1341_s29 = sand.u32 (!%p1209_p8), 1, %s1119_s19  }
  0x60   : > { %s726_s17 = sshll.u32 (!%p1209_p8), %s1341_s29, 6  ;;  %s234_s7 = scalar_lea.sflag (!%p1209_p8), [#allocation3], %s1341_s29 }
  0x61   : > { %s1345_s6 = scalar_lea.vmem (!%p1209_p8), [#allocation2], %s726_s17  ;;  %p1436_p4 = scmp.ne.s32.totalorder (!%p1209_p8), %s1429_s24, 0 }
  0x66   : > { %1102 = dma.done.wait (%p1436_p4), %s234_s7, 1024  }
  0x67   : > { %1104 = vsyncadd (%p1436_p4), %s234_s7, 4294966272  ;;  %p1437_p5 = scmp.eq.s32.totalorder %s1190_s22, 0 }
  0x69   : > { %1106 = dma.done.wait (%p1437_p5), [#allocation6], 2048   ;;  %p1438_p8 = pmov %p1437_p5 }
  0x6a   : > { %v939_v0 = vld [vmem:[#allocation5] sm:$0xff]   ;;  %v940_v1 = vld [vmem:[#allocation5 + $0x8] sm:$0xff]   ;;  %v941_v2 = vld [vmem:[#allocation5 + $0x10] sm:$0xff]   ;;  %s729_s11 = sshll.u32 %s1341_s29, 5  ;;  %s770_s15 = sshll.u32 %s1190_s22, 9 }
  0x6b   : > { %1108 = vsyncadd (%p1438_p8), [#allocation6], 4294965248  ;;  %818 = vmatprep.subr.bf16.mxu0 %v939_v0  ;;  %v942_v3 = vld [vmem:[#allocation5 + $0x18] sm:$0xff]   ;;  %v275_v4 = vld [vmem:[%s1345_s6] sm:$0xff]  ;;  %s271_s28 = scalar_lea.vmem [#allocation8], %s729_s11  ;;  %s1376_s12 = scalar_lea.hbm %s1425_s5, %s770_s15 }
  0x6c   : > { %819 = vmatpush3.bf16.msra.mxu0 %v939_v0  ;;  %v276_v5 = vld [vmem:[%s1345_s6 + $0x8] sm:$0xff]  ;;  %v943_v7 = vld [vmem:[#allocation5 + $0x20] sm:$0xff]   ;;  %v949_v10 = vld [vmem:[#allocation7 + $0x10] sm:$0xff]   ;;  %s625_s30 = sshll.u32 %s271_s28, 4  ;;  %s612_s22 = scalar_lea.sflag [#allocation4], %s1341_s29  ;;  %s1371_s30 = int_to_ptr.vmem [resolvable:$true] %s625_s30 }
  0x6d   : > { %820 = vmatprep.subr.bf16.mxu0 %v940_v1  ;;  %v283_v6 = vpack.c.bf16 %v276_v5, %v275_v4  ;;  %v947_v8 = vld [vmem:[#allocation7] sm:$0xff]   ;;  %v948_v9 = vld [vmem:[#allocation7 + $0x8] sm:$0xff]   ;;  %v945_v12 = vld [vmem:[#allocation5 + $0x30] sm:$0xff]   ;;  %s1057_s13 = scalar_lea.vmem %s1371_s30, 512  ;;  %p1439_p0 = scmp.ne.s32.totalorder %s1434_s23, 0 }
  0x6e   : > { %842 = vmatprep.subr.bf16.mxu1 %v947_v8  ;;  %v944_v11 = vld [vmem:[#allocation5 + $0x28] sm:$0xff]   ;;  %v946_v13 = vld [vmem:[#allocation5 + $0x38] sm:$0xff]   ;;  %v277_v14 = vld [vmem:[%s1345_s6 + $0x10] sm:$0xff]  ;;  %p1058_p11 = scmp.ne.s32.totalorder %s1371_s30, %s1057_s13  ;;  %s1136_s17 = smov [#allocation8]  }
  0x6f   : > { %834 = vmatprep.mubr.bf16.mxu0 %v283_v6  ;;  %843 = vmatpush3.bf16.msra.mxu1 %v947_v8  ;;  %v278_v15 = vld [vmem:[%s1345_s6 + $0x18] sm:$0xff]  ;;  %v279_v16 = vld [vmem:[%s1345_s6 + $0x20] sm:$0xff]  ;;  %v280_v17 = vld [vmem:[%s1345_s6 + $0x28] sm:$0xff]  ;;  %s1061_s7 = sshll.u32 %s1136_s17, 4  ;;  %s1062_s7 = int_to_ptr.vmem [resolvable:$false] %s1061_s7 }
  0x70   : > { %821 = vmatpush3.bf16.msra.mxu0 %v940_v1  ;;  %844 = vmatprep.subr.bf16.mxu1 %v948_v9  ;;  %v284_v18 = vpack.c.bf16 %v278_v15, %v277_v14  ;;  %v285_v19 = vpack.c.bf16 %v280_v17, %v279_v16  ;;  %v281_v20 = vld [vmem:[%s1345_s6 + $0x30] sm:$0xff]  ;;  %v282_v21 = vld [vmem:[%s1345_s6 + $0x38] sm:$0xff]  ;;  %v951_v24 = vld [vmem:[#allocation7 + $0x20] sm:$0xff]   ;;  %p1059_p1 = pnand %p1058_p11, %p1439_p0  ;;  %s1063_s6 = scalar_lea.vmem %s1062_s7, 1024 }
  0x71   : > { %822 = vmatprep.subr.bf16.mxu0 %v941_v2  ;;  %v286_v22 = vpack.c.bf16 %v282_v21, %v281_v20  ;;  %v950_v23 = vld [vmem:[#allocation7 + $0x18] sm:$0xff]   ;;  %v952_v25 = vld [vmem:[#allocation7 + $0x28] sm:$0xff]   ;;  %v953_v26 = vld [vmem:[#allocation7 + $0x30] sm:$0xff]   ;;  %p1064_p7 = scmp.lt.s32.totalorder %s1371_s30, %s1062_s7  ;;  %p1065_p9 = scmp.lt.s32.totalorder %s1063_s6, %s1057_s13 }
  0x72   : > { %v954_v27 = vld [vmem:[#allocation7 + $0x38] sm:$0xff]   ;;  %v730_v28 = vld [vmem:[%s1422_s2] ss:$0 sm:$0xff]  ;;  %p1060_p3 = pneg %p1059_p1 }
  0x73   : > { %845 = vmatpush3.bf16.msra.mxu1 %v948_v9  ;;  %v739_v58 = vld [vmem:[%s1424_s4] ss:$0 sm:$0xff]  ;;  %p1066_p12 = por %p1065_p9, %p1064_p7 }
  0x74   : > { %823 = vmatpush3.bf16.msra.mxu0 %v941_v2  ;;  %846 = vmatprep.subr.bf16.mxu1 %v949_v10 }
  0x75   : > { %824 = vmatprep.subr.bf16.mxu0 %v942_v3  ;;  %p1067_p2 = pnand %p1066_p12, %p1060_p3 }
  0x77   : > { %847 = vmatpush3.bf16.msra.mxu1 %v949_v10 }
  0x78   : > { %825 = vmatpush3.bf16.msra.mxu0 %v942_v3  ;;  %848 = vmatprep.subr.bf16.mxu1 %v950_v23 }
  0x79   : > { %826 = vmatprep.subr.bf16.mxu0 %v943_v7 }
  0x7b   : > { %849 = vmatpush3.bf16.msra.mxu1 %v950_v23 }
  0x7c   : > { %827 = vmatpush3.bf16.msra.mxu0 %v943_v7  ;;  %850 = vmatprep.subr.bf16.mxu1 %v951_v24 }
  0x7d   : > { %828 = vmatprep.subr.bf16.mxu0 %v944_v11 }
  0x7f   : > { %851 = vmatpush3.bf16.msra.mxu1 %v951_v24 }
  0x80   : > { %829 = vmatpush3.bf16.msra.mxu0 %v944_v11  ;;  %852 = vmatprep.subr.bf16.mxu1 %v952_v25 }
  0x81   : > { %830 = vmatprep.subr.bf16.mxu0 %v945_v12 }
  0x83   : > { %853 = vmatpush3.bf16.msra.mxu1 %v952_v25 }
  0x84   : > { %831 = vmatpush3.bf16.msra.mxu0 %v945_v12  ;;  %854 = vmatprep.subr.bf16.mxu1 %v953_v26 }
  0x85   : > { %832 = vmatprep.subr.bf16.mxu0 %v946_v13 }
  0x87   : > { %855 = vmatpush3.bf16.msra.mxu1 %v953_v26 }
  0x88   : > { %833 = vmatpush3.bf16.msra.mxu0 %v946_v13  ;;  %856 = vmatprep.subr.bf16.mxu1 %v954_v27 }
  0x8b   : > { %835 = vmatmul.mubr.bf16.vlgmr.msra.gmra.mrb[0].mxu0 %v284_v18  ;;  %857 = vmatpush3.bf16.msra.mxu1 %v954_v27 }
  0x8c   : > { %838 = vmatprep.mubr.bf16.mxu0 %v285_v19 }
  0x93   : > { %839 = vmatmul.mubr.bf16.gmra.mrb[4].mxu0 %v286_v22 }
 0x15e   : > { %v836_v29 = vpop.f32.mrb[0].mxu0 }
 0x15f   : > { %v401_v30 = vadd.f32 %v836_v29, %v730_v28  ;;  %v392_v31 = vpop.f32.mrb[1].mxu0 }
 0x160   : > { %v393_v32 = vadd.f32 %v730_v28, %v392_v31  ;;  %v837_v33 = vpop.f32.mrb[2].mxu0 }
 0x161   : > { %955 = vtanh.f32 %v401_v30  ;;  %v404_v34 = vadd.f32 %v837_v33, %v730_v28  ;;  %v395_v35 = vpop.f32.mrb[3].mxu0 }
 0x162   : > { %957 = vtanh.f32 %v393_v32  ;;  %v396_v36 = vadd.f32 %v730_v28, %v395_v35 }
 0x163   : > { %959 = vtanh.f32 %v404_v34 }
 0x164   : > { %961 = vtanh.f32 %v396_v36 }
 0x166   : > { %v840_v37 = vpop.f32.mrb[4].mxu0 }
 0x167   : > { %v417_v38 = vadd.f32 %v840_v37, %v730_v28  ;;  %v408_v39 = vpop.f32.mrb[5].mxu0 }
 0x168   : > { %v409_v40 = vadd.f32 %v730_v28, %v408_v39  ;;  %v841_v41 = vpop.f32.mrb[6].mxu0 }
 0x169   : > { %963 = vtanh.f32 %v417_v38  ;;  %v420_v42 = vadd.f32 %v841_v41, %v730_v28  ;;  %v411_v43 = vpop.f32.mrb[7].mxu0 }
 0x16a   : > { %965 = vtanh.f32 %v409_v40  ;;  %v412_v44 = vadd.f32 %v730_v28, %v411_v43 }
 0x16b   : > { %v956_v45 = vpop.eup %955  ;;  %967 = vtanh.f32 %v420_v42 }
 0x16c   : > { %v958_v46 = vpop.eup %957  ;;  %969 = vtanh.f32 %v412_v44 }
 0x16d   : > { %v960_v47 = vpop.eup %959 }
 0x16e   : > { %v962_v48 = vpop.eup %961  ;;  %v432_v49 = vpack.c.bf16 %v960_v47, %v956_v45 }
 0x16f   : > { %v431_v50 = vpack.c.bf16 %v962_v48, %v958_v46 }
 0x171   : > { %858 = vmatprep.mubr.bf16.mxu1 %v431_v50 }
 0x172   : > { %859 = vmatmul.mubr.bf16.vlgmr.msra.gmra.mrb[0].mxu1 %v432_v49 }
 0x173   : > { %v964_v51 = vpop.eup %963 }
 0x174   : > { %v966_v52 = vpop.eup %965 }
 0x175   : > { %v968_v53 = vpop.eup %967 }
 0x176   : > { %v970_v54 = vpop.eup %969  ;;  %v434_v55 = vpack.c.bf16 %v968_v53, %v964_v51 }
 0x177   : > { %v433_v56 = vpack.c.bf16 %v970_v54, %v966_v52 }
 0x179   : > { %862 = vmatprep.mubr.bf16.mxu1 %v433_v56 }
 0x17a   : > { %863 = vmatmul.mubr.bf16.gmra.mrb[4].mxu1 %v434_v55 }
 0x245   : > { %v860_v57 = vpop.f32.mrb[0].mxu1 }
 0x246   : > { %v540_v59 = vpop.f32.mrb[1].mxu1  ;;  %v549_v61 = vadd.f32 %v860_v57, %v739_v58 }
 0x247   : > { %v861_v60 = vpop.f32.mrb[2].mxu1  ;;  %v541_v0 = vadd.f32 %v739_v58, %v540_v59 }
 0x248   : > { %v552_v62 = vadd.f32 %v861_v60, %v739_v58  ;;  %v543_v63 = vpop.f32.mrb[3].mxu1 }
 0x249   : > { %v544_v1 = vadd.f32 %v739_v58, %v543_v63 }
 0x24a   : > { %v779_v2 = vpack.c.bf16 %v552_v62, %v549_v61 }
 0x24b   : > { %v774_v3 = vpack.c.bf16 %v544_v1, %v541_v0 }
 0x24c   : > { %791 = vst [vmem:[%s271_s28 + $0x8] sm:$0xff] %v779_v2  }
 0x24d   : > { %775 = vst [vmem:[%s271_s28] sm:$0xff] %v774_v3   ;;  %v864_v4 = vpop.f32.mrb[4].mxu1 }
 0x24e   : > { %v556_v5 = vpop.f32.mrb[5].mxu1  ;;  %v565_v7 = vadd.f32 %v864_v4, %v739_v58 }
 0x24f   : > { %v865_v6 = vpop.f32.mrb[6].mxu1  ;;  %v557_v10 = vadd.f32 %v739_v58, %v556_v5 }
 0x250   : > { %v568_v8 = vadd.f32 %v865_v6, %v739_v58  ;;  %v559_v9 = vpop.f32.mrb[7].mxu1 }
 0x251   : > { %v560_v11 = vadd.f32 %v739_v58, %v559_v9 }
 0x252   : > { %v789_v12 = vpack.c.bf16 %v568_v8, %v565_v7 }
 0x253   : > { %v784_v13 = vpack.c.bf16 %v560_v11, %v557_v10 }
 0x254   : > { %793 = vst [vmem:[%s271_s28 + $0x18] sm:$0xff] %v789_v12  }
 0x255   : > { %792 = vst [vmem:[%s271_s28 + $0x10] sm:$0xff] %v784_v13  }
 0x256   : > { %1070 = shalt.err (!%p1067_p2)
}
 0x257   : > { %s1071_s24 = scalar_lea.hbm %s1376_s12, 512  ;;  %s1075_s10 = scalar_lea.hbm %s1425_s5, 1024 }
 0x258   : > { %p1072_p13 = scmp.ne.s32.totalorder %s1376_s12, %s1071_s24  ;;  %p1076_p4 = scmp.lt.u32.totalorder %s1376_s12, %s1425_s5 }
 0x259   : > { %p1077_p5 = scmp.lt.u32.totalorder %s1075_s10, %s1071_s24  ;;  %p1079_p11 = scmp.lt.u32.totalorder %s1071_s24, %s1376_s12 }
 0x25a   : > { %p1073_p6 = pnand %p1072_p13, %p1439_p0 }
 0x25b   : > { %p1078_p8 = por %p1077_p5, %p1076_p4 }
 0x25c   : > { %p1074_p10 = pneg %p1073_p6 }
 0x25d   : > { %p1080_p1 = por %p1079_p11, %p1078_p8 }
 0x25f   : > { %p1081_p3 = pnand %p1080_p1, %p1074_p10 }
 0x261   : > { %1084 = shalt.err (!%p1081_p3)
}
 0x262   : > { %s1137_s15 = smov 64   ;;  %s1138_s16 = smov 4  }
 0x263   : > { %876 = dma.vmem_to_hbm [thread:$0]  (%p1439_p0), %s1371_s30, 512, %s1376_s12, %s612_s22, %s1137_s15, %s1137_s15, %s1138_s16  }
 0x264 PF: > { %s640_s9 = sand.u32 1, %s1115_s18   ;;  %p1440_p7 = scmp.ne.s32.totalorder %s1430_s25, 0 }
 0x265   : > { %p1441_p9 = scmp.ge.s32.totalorder %s1127_s21, 2  ;;  %s641_s13 = scalar_lea.sflag [#allocation4], %s640_s9 }
 0x267   : > { %p890_p12 = pnand %p1441_p9, %p1440_p7 }
 0x269   : > { %1110 = dma.done.wait (!%p890_p12), %s641_s13, 512  }
 0x26a   : > { %1112 = vsyncadd (!%p890_p12), %s641_s13, 4294966784  ;;  %p19_p2 = scmp.ge.s32.totalorder %s1279_s14, 4   ;;  %s1442_s18 = smov %s1119_s19 }
 0x26b   : > { %s1443_s19 = smov %s1123_s20  ;;  %s1444_s20 = smov %s1295_s27 }
 0x26c   : > { %s1445_s21 = smov %s1279_s14  ;;  %21 = sbr.rel (!%p19_p2) target bundleno = 6 (0x6), region = 93 }
 0x273   :  { %646 = vsyncpa [#allocation3], 1 }
 0x274   :  { %648 = vsyncpa [#allocation3 + $0x1], 1 }
 0x275   :  { %649 = vsyncpa [#allocation6], 1 }
 0x276   :  { %650 = vsyncpa [#allocation4], 1 }
 0x277   :  { %652 = vsyncpa [#allocation4 + $0x1], 1 }

</bundles_post_ra>
